<compile_context>
chip_gen: v5e
topology: v5e:2x2
jax: 0.10.0
libtpu: 0.0.40
codegen_flags: <defaults>
</compile_context>

<pallas_src>
import functools

import jax
import jax.numpy as jnp
from jax.experimental import pallas as pl
from jax.experimental.pallas import tpu as pltpu

LANE = 128               # lane (last-dim) granularity
SUBLANE = 8              # sublane (second-to-last dim) granularity
_MAX_TILE_B = 2048       # amortize ~0.35 us per grid step
_TILE_VMEM_BUDGET = 24 << 20   # bytes reserved for double-buffered x/out tiles


def _round_up(v, m):
    return (v + m - 1) // m * m


def _cdiv(a, b):
    return -(-a // b)


# --------------------------------------------------------------------------- #
# Kernel
# --------------------------------------------------------------------------- #
def cnode2_kernel(gate_ref, x_ref, w1t_ref, b1_ref, w2t_ref, b2_ref, o_ref):
    x = x_ref[...].astype(jnp.float32)
    mm_dtype = w1t_ref.dtype          # bf16 weights => bf16 MXU operands, f32 acc

    # fcc1: x @ W1^T + b1  (bias add rides in free VPU slots under the MXU)
    h = jnp.dot(x.astype(mm_dtype), w1t_ref[...],
                preferred_element_type=jnp.float32) + b1_ref[...]
    # fcc2: h @ W2^T + b2
    fx = jnp.dot(h.astype(mm_dtype), w2t_ref[...],
                 preferred_element_type=jnp.float32) + b2_ref[...]

    # xT_fx = sum(x * fx, -1, keepdims) -> (tile_b, 1); padded lanes are 0.
    xT_fx = jnp.sum(x * fx, axis=-1, keepdims=True)
    dxdt = x * (fx - xT_fx)
    o_ref[...] = (gate_ref[0, 0] * dxdt).astype(o_ref.dtype)


# --------------------------------------------------------------------------- #
# One-time parameter / state preparation (call OUTSIDE the solver loop)
# --------------------------------------------------------------------------- #
def prepare_cnode2_params(w1, b1, w2, b2, weights_dtype=jnp.float32):
    """Transpose PyTorch-style (out, in) weights and zero-pad the feature dim to a
    multiple of 128 (lane-dense). Zero padding keeps padded lanes of h/fx/x exactly
    zero, so xT_fx and the output are unaffected."""
    N = w1.shape[0]
    N_pad = _round_up(N, LANE)
    p = N_pad - N
    w1_t = jnp.pad(jnp.asarray(w1, jnp.float32).T, ((0, p), (0, p))).astype(weights_dtype)
    w2_t = jnp.pad(jnp.asarray(w2, jnp.float32).T, ((0, p), (0, p))).astype(weights_dtype)
    b1_p = jnp.pad(jnp.asarray(b1, jnp.float32), (0, p)).reshape(1, N_pad)
    b2_p = jnp.pad(jnp.asarray(b2, jnp.float32), (0, p)).reshape(1, N_pad)
    return w1_t, b1_p, w2_t, b2_p


def choose_batch_tiling(B, N_pad):
    """Pick (tile_b, B_pad): biggest tile that fits the VMEM tile budget, balanced
    to minimize batch padding, grid kept even (>=2 sublane groups) for v7x megacore."""
    B_sub = _round_up(max(B, 1), SUBLANE)
    bytes_per_row = 2 * 2 * N_pad * 4                      # x + out, double-buffered, f32
    cap = max(SUBLANE, (_TILE_VMEM_BUDGET // bytes_per_row) // SUBLANE * SUBLANE)
    cap = min(cap, _MAX_TILE_B)
    num_tiles = max(1, _cdiv(B_sub, cap))
    if B_sub >= 2 * SUBLANE and num_tiles % 2 == 1:        # keep both v7x TCs busy
        num_tiles += 1
    tile_b = _round_up(_cdiv(B_sub, num_tiles), SUBLANE)
    B_pad = _round_up(B_sub, tile_b)
    return tile_b, B_pad


def pad_state(x, N_pad, B_pad):
    """Pad the ODE state ONCE before integration; keep it padded across all steps."""
    B, N = x.shape
    if B == B_pad and N == N_pad:
        return jnp.asarray(x, jnp.float32)
    return jnp.pad(jnp.asarray(x, jnp.float32), ((0, B_pad - B), (0, N_pad - N)))


# --------------------------------------------------------------------------- #
# pallas_call wrapper
# --------------------------------------------------------------------------- #
def _cnode2_pallas(x_p, w1_t, b1_p, w2_t, b2_p, gate, tile_b):
    B_pad, N_pad = x_p.shape
    assert B_pad % tile_b == 0 and N_pad % LANE == 0

    wbytes = (w1_t.size * jnp.dtype(w1_t.dtype).itemsize
              + w2_t.size * jnp.dtype(w2_t.dtype).itemsize)
    bbytes = (b1_p.size + b2_p.size) * 4
    tile_bytes = 2 * 2 * tile_b * N_pad * 4                # x + out tiles, double-buffered
    vmem_limit = int(min(max(wbytes + bbytes + tile_bytes + (8 << 20), 16 << 20),
                         128 << 20))

    cost = pl.CostEstimate(
        flops=4 * B_pad * N_pad * N_pad + 6 * B_pad * N_pad,
        transcendentals=0,
        bytes_accessed=2 * B_pad * N_pad * 4 + wbytes + bbytes,
    )

    resident = dict(pipeline_mode=pl.Buffered(1))          # single-buffer resident params
    gate_2d = jnp.asarray(gate, jnp.float32).reshape(1, 1)

    return pl.pallas_call(
        cnode2_kernel,
        out_shape=jax.ShapeDtypeStruct((B_pad, N_pad), x_p.dtype),
        grid=(B_pad // tile_b,),
        in_specs=[
            pl.BlockSpec(memory_space=pltpu.MemorySpace.SMEM),           # gate scalar
            pl.BlockSpec((tile_b, N_pad), lambda i: (i, 0)),             # x tile (pipelined)
            pl.BlockSpec((N_pad, N_pad), lambda i: (0, 0), **resident),  # W1^T (resident)
            pl.BlockSpec((1, N_pad), lambda i: (0, 0), **resident),      # b1   (resident)
            pl.BlockSpec((N_pad, N_pad), lambda i: (0, 0), **resident),  # W2^T (resident)
            pl.BlockSpec((1, N_pad), lambda i: (0, 0), **resident),      # b2   (resident)
        ],
        out_specs=pl.BlockSpec((tile_b, N_pad), lambda i: (i, 0)),       # lane-dense out
        compiler_params=pltpu.CompilerParams(
            dimension_semantics=("parallel",),            # batch axis shards across TCs
            vmem_limit_bytes=vmem_limit,
        ),
        cost_estimate=cost,
    )(gate_2d, x_p, w1_t, b1_p, w2_t, b2_p)


@functools.partial(jax.jit, static_argnames=("tile_b",))
def ode_func_cnode2_padded(x_p, w1_t, b1_p, w2_t, b2_p, gate, *, tile_b):
    """Hot path: x_p is already padded to (B_pad, N_pad) with B_pad % tile_b == 0.
    Returns dx/dt in the same padded layout (padded entries are exactly 0)."""
    return _cnode2_pallas(x_p, w1_t, b1_p, w2_t, b2_p, gate, tile_b)


@jax.jit
def ode_func_cnode2(x, w1_t, b1_p, w2_t, b2_p, gate):
    """Convenience one-off entry point: pads only if needed, slices back to (B, N)."""
    B, N = x.shape
    N_pad = w1_t.shape[0]
    tile_b, B_pad = choose_batch_tiling(B, N_pad)
    aligned = (B == B_pad and N == N_pad)
    x_p = x if aligned else jnp.pad(jnp.asarray(x, jnp.float32),
                                    ((0, B_pad - B), (0, N_pad - N)))
    out_p = _cnode2_pallas(x_p, w1_t, b1_p, w2_t, b2_p, gate, tile_b)
    out_p = out_p if aligned else out_p[:B, :N]
    return out_p.astype(x.dtype)


# --------------------------------------------------------------------------- #
# Self-test
# --------------------------------------------------------------------------- #
def _reference(x, w1, b1, w2, b2, gate):
    hi = jax.lax.Precision.HIGHEST
    fx = jnp.dot(x, w1.T, precision=hi) + b1
    fx = jnp.dot(fx, w2.T, precision=hi) + b2
    xT_fx = jnp.sum(x * fx, axis=-1, keepdims=True)
    return gate * (x * (fx - xT_fx))


if __name__ == "__main__":
    key = jax.random.PRNGKey(0)
    gate = 1.0  # identity_gate=False -> buffer gate = 1.0

    def make_case(key, B, N):
        kx, kw1, kb1, kw2, kb2 = jax.random.split(key, 5)
        x = jax.random.normal(kx, (B, N), dtype=jnp.float32)
        bound = 1.0 / (N ** 0.5)   # nn.Linear default init range
        w1 = jax.random.uniform(kw1, (N, N), jnp.float32, -bound, bound)
        b1 = jax.random.uniform(kb1, (N,), jnp.float32, -bound, bound)
        w2 = jax.random.uniform(kw2, (N, N), jnp.float32, -bound, bound)
        b2 = jax.random.uniform(kb2, (N,), jnp.float32, -bound, bound)
        return x, w1, b1, w2, b2

    ok = True
    k1, k2 = jax.random.split(key)
    # Case 1: aligned-ish small shape. Case 2: unaligned B and N.
    for kc, B, N in [(k1, 8, 32), (k2, 12, 50)]:
        x, w1, b1, w2, b2 = make_case(kc, B, N)
        w1_t, b1_p, w2_t, b2_p = prepare_cnode2_params(w1, b1, w2, b2)

        # One-off path (auto pad / unpad).
        out = jax.block_until_ready(ode_func_cnode2(x, w1_t, b1_p, w2_t, b2_p, gate))
        ref = _reference(x, w1, b1, w2, b2, gate)
        ok = ok and out.shape == (B, N)
        ok = ok and bool(jnp.allclose(out, ref, atol=1e-4, rtol=1e-4))

        # Hot path: state stays padded across the whole (toy Euler) solver loop.
        N_pad = w1_t.shape[0]
        tile_b, B_pad = choose_batch_tiling(B, N_pad)
        x_p = pad_state(x, N_pad, B_pad)
        x_ref_state = x
        dt = 0.01
        for _ in range(3):
            dx_p = ode_func_cnode2_padded(x_p, w1_t, b1_p, w2_t, b2_p, gate,
                                          tile_b=tile_b)
            x_p = x_p + dt * dx_p
            x_ref_state = x_ref_state + dt * _reference(x_ref_state, w1, b1, w2, b2, gate)
        x_final = jax.block_until_ready(x_p)[:B, :N]
        ok = ok and bool(jnp.allclose(x_final, x_ref_state, atol=1e-3, rtol=1e-3))

    assert ok
    print("KERNEL_OK")
</pallas_src>

<mosaic_0001>
module attributes {stable_mosaic.version = 11 : i64} {
  func.func @cnode2_kernel(%arg0: i32, %arg1: memref<1x1xf32, #tpu.memory_space<smem>>, %arg2: memref<8x128xf32, #tpu.memory_space<vmem>>, %arg3: memref<128x128xf32, #tpu.memory_space<vmem>>, %arg4: memref<1x128xf32, #tpu.memory_space<vmem>>, %arg5: memref<128x128xf32, #tpu.memory_space<vmem>>, %arg6: memref<1x128xf32, #tpu.memory_space<vmem>>, %arg7: memref<8x128xf32, #tpu.memory_space<vmem>>) attributes {dimension_semantics = [#tpu.dimension_semantics<parallel>], iteration_bounds = array<i64: 1>, scalar_prefetch = 0 : i64, scratch_operands = 0 : i64, tpu.core_type = #tpu.core_type<tc>, window_params = [{transform_indices = @transform_0, window_bounds = array<i64: 1, 1>}, {transform_indices = @transform_1, window_bounds = array<i64: 8, 128>}, {pipeline_mode = #tpu.pipeline_mode<synchronous>, transform_indices = @transform_2, window_bounds = array<i64: 128, 128>}, {pipeline_mode = #tpu.pipeline_mode<synchronous>, transform_indices = @transform_3, window_bounds = array<i64: 1, 128>}, {pipeline_mode = #tpu.pipeline_mode<synchronous>, transform_indices = @transform_4, window_bounds = array<i64: 128, 128>}, {pipeline_mode = #tpu.pipeline_mode<synchronous>, transform_indices = @transform_5, window_bounds = array<i64: 1, 128>}, {transform_indices = @transform_6, window_bounds = array<i64: 8, 128>}]} {
    %c0 = arith.constant 0 : index
    %c0_0 = arith.constant 0 : index
    %0 = vector.load %arg2[%c0, %c0_0] : memref<8x128xf32, #tpu.memory_space<vmem>>, vector<8x128xf32>
    %c0_1 = arith.constant 0 : index
    %c0_2 = arith.constant 0 : index
    %1 = vector.load %arg3[%c0_1, %c0_2] : memref<128x128xf32, #tpu.memory_space<vmem>>, vector<128x128xf32>
    %cst = arith.constant dense<0.000000e+00> : vector<8x128xf32>
    %2 = tpu.matmul %0, %1, %cst {dimension_numbers = #tpu.dot_dimension_numbers<[1], [0], [0], [1], [0, 0, 1, 1], [], []>} : vector<8x128xf32>, vector<128x128xf32>, vector<8x128xf32> -> vector<8x128xf32>
    %c0_3 = arith.constant 0 : index
    %c0_4 = arith.constant 0 : index
    %3 = vector.load %arg4[%c0_3, %c0_4] : memref<1x128xf32, #tpu.memory_space<vmem>>, vector<1x128xf32>
    %4 = vector.broadcast %3 : vector<1x128xf32> to vector<8x128xf32>
    %5 = arith.addf %2, %4 : vector<8x128xf32>
    %c0_5 = arith.constant 0 : index
    %c0_6 = arith.constant 0 : index
    %6 = vector.load %arg5[%c0_5, %c0_6] : memref<128x128xf32, #tpu.memory_space<vmem>>, vector<128x128xf32>
    %cst_7 = arith.constant dense<0.000000e+00> : vector<8x128xf32>
    %7 = tpu.matmul %5, %6, %cst_7 {dimension_numbers = #tpu.dot_dimension_numbers<[1], [0], [0], [1], [0, 0, 1, 1], [], []>} : vector<8x128xf32>, vector<128x128xf32>, vector<8x128xf32> -> vector<8x128xf32>
    %c0_8 = arith.constant 0 : index
    %c0_9 = arith.constant 0 : index
    %8 = vector.load %arg6[%c0_8, %c0_9] : memref<1x128xf32, #tpu.memory_space<vmem>>, vector<1x128xf32>
    %9 = vector.broadcast %8 : vector<1x128xf32> to vector<8x128xf32>
    %10 = arith.addf %7, %9 : vector<8x128xf32>
    %11 = arith.mulf %0, %10 : vector<8x128xf32>
    %cst_10 = arith.constant dense<0.000000e+00> : vector<8xf32>
    %12 = vector.multi_reduction <add>, %11, %cst_10 [1] : vector<8x128xf32> to vector<8xf32>
    %13 = vector.shape_cast %12 : vector<8xf32> to vector<8x1xf32>
    %14 = vector.broadcast %13 : vector<8x1xf32> to vector<8x128xf32>
    %15 = arith.subf %10, %14 : vector<8x128xf32>
    %16 = arith.mulf %0, %15 : vector<8x128xf32>
    %c0_11 = arith.constant 0 : index
    %c0_12 = arith.constant 0 : index
    %17 = memref.load %arg1[%c0_11, %c0_12] : memref<1x1xf32, #tpu.memory_space<smem>>
    %18 = vector.broadcast %17 : f32 to vector<8x128xf32>
    %19 = arith.mulf %18, %16 : vector<8x128xf32>
    %c0_13 = arith.constant 0 : index
    %c0_14 = arith.constant 0 : index
    %20 = vector.load %arg7[%c0_13, %c0_14] : memref<8x128xf32, #tpu.memory_space<vmem>>, vector<8x128xf32>
    tpu.vector_store %arg7[%c0_13, %c0_14], %19 {strides = array<i32>} : memref<8x128xf32, #tpu.memory_space<vmem>>, vector<8x128xf32>,
    return
  }
  func.func @transform_0(%arg0: i32) -> (i32, i32) {
    %c0_i32 = arith.constant 0 : i32
    %c0_i32_0 = arith.constant 0 : i32
    %c0_i32_1 = arith.constant 0 : i32
    return %c0_i32, %c0_i32_0 : i32, i32
  }
  func.func @transform_1(%arg0: i32) -> (i32, i32) {
    %c0_i32 = arith.constant 0 : i32
    %c0_i32_0 = arith.constant 0 : i32
    return %arg0, %c0_i32 : i32, i32
  }
  func.func @transform_2(%arg0: i32) -> (i32, i32) {
    %c0_i32 = arith.constant 0 : i32
    %c0_i32_0 = arith.constant 0 : i32
    %c0_i32_1 = arith.constant 0 : i32
    return %c0_i32, %c0_i32_0 : i32, i32
  }
  func.func @transform_3(%arg0: i32) -> (i32, i32) {
    %c0_i32 = arith.constant 0 : i32
    %c0_i32_0 = arith.constant 0 : i32
    %c0_i32_1 = arith.constant 0 : i32
    return %c0_i32, %c0_i32_0 : i32, i32
  }
  func.func @transform_4(%arg0: i32) -> (i32, i32) {
    %c0_i32 = arith.constant 0 : i32
    %c0_i32_0 = arith.constant 0 : i32
    %c0_i32_1 = arith.constant 0 : i32
    return %c0_i32, %c0_i32_0 : i32, i32
  }
  func.func @transform_5(%arg0: i32) -> (i32, i32) {
    %c0_i32 = arith.constant 0 : i32
    %c0_i32_0 = arith.constant 0 : i32
    %c0_i32_1 = arith.constant 0 : i32
    return %c0_i32, %c0_i32_0 : i32, i32
  }
  func.func @transform_6(%arg0: i32) -> (i32, i32) {
    %c0_i32 = arith.constant 0 : i32
    %c0_i32_0 = arith.constant 0 : i32
    return %arg0, %c0_i32 : i32, i32
  }
}

</mosaic_0001>

<bundles_post_ra>
// kernel: ode_func_cnode2.1
= control target key start
LH: loop header
LB: loop body
LE: loop exit
PB: predicated region body
PF: predicated region fallthrough
CT: control target
= control target key end

     0   :  { %12 = vsyncpa [#allocation4], 0  ;;  %s311_s0 = inlined_call_operand.<no memory space> [shape: f32[1,1], index: 0, kind: input, shape index: {}]   ;;  %s312_s1 = inlined_call_operand.vmem [shape: f32[8,128], index: 1, kind: input, shape index: {}]   ;;  %s313_s2 = inlined_call_operand.hbm [shape: f32[128,128], index: 2, kind: input, shape index: {}]   ;;  %s314_s3 = inlined_call_operand.vmem [shape: f32[1,128], index: 3, kind: input, shape index: {}]   ;;  %s315_s4 = inlined_call_operand.hbm [shape: f32[128,128], index: 4, kind: input, shape index: {}]   ;;  %s316_s5 = inlined_call_operand.vmem [shape: f32[1,128], index: 5, kind: input, shape index: {}]   ;;  %s317_s6 = inlined_call_operand.hbm [shape: f32[8,128], index: 6, kind: output, shape index: {}]  }
   0x1   :  { %13 = vsyncpa [#allocation7], 0 }
   0x2   :  { %14 = vsyncpa [#allocation5], 0  ;;  %s23_s23 = sshll.u32 %s313_s2, 4  ;;  %s250_s24 = smov [#allocation3]   ;;  %s24_s23 = int_to_ptr.hbm [resolvable:$true] %s23_s23 }
   0x3   :  { %s25_s25 = sshll.u32 %s250_s24, 4  ;;  %s38_s28 = sshll.u32 %s315_s4, 4  ;;  %s26_s25 = int_to_ptr.vmem [resolvable:$true] %s25_s25  ;;  %s39_s28 = int_to_ptr.hbm [resolvable:$true] %s38_s28 }
   0x4   :  { %s251_s29 = smov 128   ;;  %s252_s30 = smov 8  }
   0x5   :  { %31 = dma.hbm_to_vmem [thread:$0]  %s24_s23, 2048, %s26_s25, [#allocation4], %s251_s29, %s251_s29, %s252_s30  }
   0x6   :  { %s253_s7 = smov [#allocation6]  }
   0x7   :  { %s40_s8 = sshll.u32 %s253_s7, 4  ;;  %s41_s8 = int_to_ptr.vmem [resolvable:$true] %s40_s8 }
   0x8   :  { %46 = dma.hbm_to_vmem [thread:$0]  %s39_s28, 2048, %s41_s8, [#allocation7], %s251_s29, %s251_s29, %s252_s30  }
   0x9   :  { %244 = dma.done.wait [#allocation4], 2048  }
   0xa   :  { %245 = vsyncadd [#allocation4], 4294965248 }
   0xb   :  { %246 = dma.done.wait [#allocation7], 2048  }
   0xc   :  { %247 = vsyncadd [#allocation7], 4294965248  ;;  %v73_v0 = vld [vmem:[#allocation3 + $0x78] sm:$0xff]  ;;  %v72_v1 = vld [vmem:[#allocation3 + $0x70] sm:$0xff]  ;;  %v144_v42 = vstv %s311_s0  ;;  %s254_s14 = smov [#allocation8]   ;;  %s154_s17 = sshll.u32 %s317_s6, 4  ;;  %s155_s17 = int_to_ptr.hbm [resolvable:$true] %s154_s17 }
   0xd   :  { %78 = vmatpush.msra.mxu0 %v73_v0  ;;  %v71_v2 = vld [vmem:[#allocation3 + $0x68] sm:$0xff]  ;;  %v70_v3 = vld [vmem:[#allocation3 + $0x60] sm:$0xff]  ;;  %v113_v4 = vld [vmem:[#allocation6 + $0x78] sm:$0xff]  ;;  %s152_s15 = sshll.u32 %s254_s14, 4  ;;  %s153_s15 = int_to_ptr.vmem [resolvable:$true] %s152_s15 }
   0xe   :  { %v69_v5 = vld [vmem:[#allocation3 + $0x58] sm:$0xff]  ;;  %118 = vmatpush.msra.mxu1 %v113_v4  ;;  %v112_v6 = vld [vmem:[#allocation6 + $0x70] sm:$0xff]  ;;  %v111_v7 = vld [vmem:[#allocation6 + $0x68] sm:$0xff] }
   0xf   :  { %79 = vmatpush.msra.mxu0 %v72_v1  ;;  %v68_v8 = vld [vmem:[#allocation3 + $0x50] sm:$0xff]  ;;  %v110_v9 = vld [vmem:[#allocation6 + $0x60] sm:$0xff]  ;;  %v67_v10 = vld [vmem:[#allocation3 + $0x48] sm:$0xff] }
  0x10   :  { %119 = vmatpush.msra.mxu1 %v112_v6  ;;  %v109_v11 = vld [vmem:[#allocation6 + $0x58] sm:$0xff]  ;;  %v66_v12 = vld [vmem:[#allocation3 + $0x40] sm:$0xff]  ;;  %v108_v13 = vld [vmem:[#allocation6 + $0x50] sm:$0xff] }
  0x11   :  { %80 = vmatpush.msra.mxu0 %v71_v2  ;;  %v65_v14 = vld [vmem:[#allocation3 + $0x38] sm:$0xff]  ;;  %v107_v15 = vld [vmem:[#allocation6 + $0x48] sm:$0xff]  ;;  %v64_v16 = vld [vmem:[#allocation3 + $0x30] sm:$0xff] }
  0x12   :  { %120 = vmatpush.msra.mxu1 %v111_v7  ;;  %v106_v17 = vld [vmem:[#allocation6 + $0x40] sm:$0xff]  ;;  %v63_v18 = vld [vmem:[#allocation3 + $0x28] sm:$0xff]  ;;  %v105_v19 = vld [vmem:[#allocation6 + $0x38] sm:$0xff] }
  0x13   :  { %81 = vmatpush.msra.mxu0 %v70_v3  ;;  %v62_v20 = vld [vmem:[#allocation3 + $0x20] sm:$0xff]  ;;  %v104_v21 = vld [vmem:[#allocation6 + $0x30] sm:$0xff]  ;;  %v61_v22 = vld [vmem:[#allocation3 + $0x18] sm:$0xff] }
  0x14   :  { %121 = vmatpush.msra.mxu1 %v110_v9  ;;  %v103_v23 = vld [vmem:[#allocation6 + $0x28] sm:$0xff]  ;;  %v60_v24 = vld [vmem:[#allocation3 + $0x10] sm:$0xff]  ;;  %v102_v25 = vld [vmem:[#allocation6 + $0x20] sm:$0xff] }
  0x15   :  { %82 = vmatpush.msra.mxu0 %v69_v5  ;;  %v59_v26 = vld [vmem:[#allocation3 + $0x8] sm:$0xff]  ;;  %v101_v27 = vld [vmem:[#allocation6 + $0x18] sm:$0xff]  ;;  %v58_v28 = vld [vmem:[#allocation3] sm:$0xff] }
  0x16   :  { %122 = vmatpush.msra.mxu1 %v109_v11  ;;  %v57_v29 = vld [vmem:[%s312_s1] sm:$0xff]  ;;  %v100_v30 = vld [vmem:[#allocation6 + $0x10] sm:$0xff]  ;;  %v99_v31 = vld [vmem:[#allocation6 + $0x8] sm:$0xff] }
  0x17   :  { %83 = vmatpush.msra.mxu0 %v68_v8  ;;  %v98_v32 = vld [vmem:[#allocation6] sm:$0xff] }
  0x18   :  { %123 = vmatpush.msra.mxu1 %v108_v13  ;;  %v170_v33 = vld [vmem:[%s314_s3] ss:$0 sm:$0xff] }
  0x19   :  { %84 = vmatpush.msra.mxu0 %v67_v10  ;;  %v171_v36 = vld [vmem:[%s316_s5] ss:$0 sm:$0xff] }
  0x1a   :  { %124 = vmatpush.msra.mxu1 %v107_v15 }
  0x1b   :  { %85 = vmatpush.msra.mxu0 %v66_v12 }
  0x1c   :  { %125 = vmatpush.msra.mxu1 %v106_v17 }
  0x1d   :  { %86 = vmatpush.msra.mxu0 %v65_v14 }
  0x1e   :  { %126 = vmatpush.msra.mxu1 %v105_v19 }
  0x1f   :  { %87 = vmatpush.msra.mxu0 %v64_v16 }
  0x20   :  { %127 = vmatpush.msra.mxu1 %v104_v21 }
  0x21   :  { %88 = vmatpush.msra.mxu0 %v63_v18 }
  0x22   :  { %128 = vmatpush.msra.mxu1 %v103_v23 }
  0x23   :  { %89 = vmatpush.msra.mxu0 %v62_v20 }
  0x24   :  { %129 = vmatpush.msra.mxu1 %v102_v25 }
  0x25   :  { %90 = vmatpush.msra.mxu0 %v61_v22 }
  0x26   :  { %130 = vmatpush.msra.mxu1 %v101_v27 }
  0x27   :  { %91 = vmatpush.msra.mxu0 %v60_v24 }
  0x28   :  { %131 = vmatpush.msra.mxu1 %v100_v30 }
  0x29   :  { %92 = vmatpush.msra.mxu0 %v59_v26 }
  0x2a   :  { %132 = vmatpush.msra.mxu1 %v99_v31 }
  0x2b   :  { %93 = vmatpush.msra.mxu0 %v58_v28 }
  0x2c   :  { %94 = vmatmul.f32.vlgmr.msra.gmra.mxu0 %v57_v29  ;;  %133 = vmatpush.msra.mxu1 %v98_v32 }
  0xa9   :  { %v95_v34 = vpop.f32.mrf.mxu0 }
  0xaa   :  { %v96_v35 = vadd.f32 %v170_v33, %v95_v34 }
  0xac   :  { %134 = vmatmul.f32.vlgmr.msra.gmra.mxu1 %v96_v35 }
 0x129   :  { %v135_v37 = vpop.f32.mrf.mxu1 }
 0x12a   :  { %v136_v38 = vadd.f32 %v171_v36, %v135_v37 }
 0x12c   :  { %v138_v39 = vmul.f32 %v136_v38, %v57_v29 }
 0x12e   :  { %139 = vadd.xlane.f32.xlu0 %v138_v39 }
 0x1a1   :  { %v140_v40 = vpop.xlane.xlu0 %139 }
 0x1a2   :  { %v141_v41 = vsub.f32 %v136_v38, %v140_v40 }
 0x1a4   :  { %v142_v43 = vmul.f32 %v141_v41, %v57_v29 }
 0x1a6   :  { %v145_v44 = vmul.f32 %v144_v42, %v142_v43 }
 0x1a8   :  { %146 = vst [vmem:[#allocation8] sm:$0xff] %v145_v44 }
 0x1a9   :  { %157 = dma.vmem_to_hbm [thread:$0]  %s153_s15, 128, %s155_s17, [#allocation5]  }
 0x1aa   :  { %248 = dma.done.wait [#allocation5], 128  }
 0x1ab   :  { %249 = vsyncadd [#allocation5], 4294967168 }
 0x1ac   :  { %162 = vsyncpa [#allocation4], 1 }
 0x1ad   :  { %163 = vsyncpa [#allocation7], 1 }
 0x1ae   :  { %164 = vsyncpa [#allocation5], 1 }

</bundles_post_ra>
